<compile_context>
chip_gen: v6e
topology: v6e:2x2x1
jax: 0.10.0
libtpu: 0.0.40
codegen_flags: <defaults>
</compile_context>

<pallas_src>
import functools

import jax
import jax.numpy as jnp
from jax import lax
from jax.experimental import pallas as pl
from jax.experimental.pallas import tpu as pltpu


# --------------------------- kernel ---------------------------

def _ternary_matmul_kernel(x_ref, w_ref, b_ref, o_ref, *scratch, compute_dtype):
    """One (TM, TN) output tile; K is the innermost ('arbitrary') grid axis."""
    k = pl.program_id(2)
    # With f32 outputs we accumulate directly into the resident output block.
    acc_ref = scratch[0] if scratch else o_ref

    @pl.when(k == 0)
    def _init():
        acc_ref[...] = jnp.zeros_like(acc_ref)

    x = x_ref[...]                                  # (TM, TK), already compute_dtype
    w = w_ref[...].astype(compute_dtype)            # int8 {-1,0,1} -> exact in bf16/f32

    # Contract K directly: x(TM,TK) . W(TN,TK) -> (TM,TN); no transpose copy.
    acc_ref[...] += lax.dot_general(
        x, w,
        dimension_numbers=(((1,), (1,)), ((), ())),
        preferred_element_type=jnp.float32,
    )

    @pl.when(k == pl.num_programs(2) - 1)
    def _finalize():
        if scratch:                                  # static (trace-time) branch
            o_ref[...] = (acc_ref[...] + b_ref[...]).astype(o_ref.dtype)
        else:
            o_ref[...] = o_ref[...] + b_ref[...]


# --------------------------- wrapper ---------------------------

def _round_up(a, m):
    return (a + m - 1) // m * m


def _pick_tile(total, base, cap, prefer_split=False):
    """Largest multiple of `base` that divides `total` and is <= cap.

    `total` is already a multiple of `base`.  With prefer_split, prefer the
    largest such divisor that yields >= 2 blocks (v7x megacore sharding).
    """
    cap = max(base, min(cap, total))
    cands = [d for d in range(base, cap + 1, base) if total % d == 0]
    if not cands:
        return base
    if prefer_split:
        multi = [d for d in cands if total // d >= 2]
        if multi:
            return max(multi)
    return max(cands)


def ternarize_weight(weight, left=-0.25, right=0.25):
    """One-shot pre-ternarization of W to int8 values {-1, 0, 1}."""
    return ((weight >= right).astype(jnp.int8) - (weight < left).astype(jnp.int8))


def ternary_linear(x, weight, bias=None, *, left=-0.25, right=0.25,
                   tile_m=256, tile_n=512, tile_k=2048,
                   compute_dtype=jnp.bfloat16, out_dtype=None):
    """y = x @ ternarize(weight).T + bias, as one tiled Pallas TPU kernel.

    `weight` may be f32 (ternarized once here) or pre-ternarized int8
    (values in {-1,0,1}; `left`/`right` ignored in that case).
    Users needing exact f32 activation math should pass compute_dtype=float32
    (ternary weights are exact in bf16; activations are not).
    """
    B, K = x.shape
    N, K2 = weight.shape
    assert K == K2, "in_features mismatch"
    out_dtype = x.dtype if out_dtype is None else out_dtype

    # Pre-ternarize to int8 once: 4x less weight HBM traffic / VMEM than f32.
    w_t = weight if weight.dtype == jnp.int8 else ternarize_weight(weight, left, right)

    # Minimal (8, 128) alignment padding only — usually a no-op.  Zero int8
    # weights and zero activations contribute 0, so results are unchanged.
    mp = _round_up(B, 8)
    np_ = _round_up(N, 128)
    kp = _round_up(K, 128)

    x_c = x.astype(compute_dtype)                    # pre-cast once (not per k step)
    if (mp, kp) != (B, K):
        x_c = jnp.pad(x_c, ((0, mp - B), (0, kp - K)))
    if (np_, kp) != (N, K):
        w_t = jnp.pad(w_t, ((0, np_ - N), (0, kp - K)))
    if bias is None:
        b_p = jnp.zeros((1, np_), jnp.float32)
    else:
        b_p = bias.astype(jnp.float32).reshape(1, N)
        if np_ != N:
            b_p = jnp.pad(b_p, ((0, 0), (0, np_ - N)))

    # Tile sizes: divisors of the aligned dims (no padding up to tiles).
    # Grow TM first for large M (each i-block re-streams all of W).
    tm = _pick_tile(mp, 8, tile_m)
    i_blocks = mp // tm
    tn = _pick_tile(np_, 128, tile_n, prefer_split=(i_blocks < 2))
    tk = _pick_tile(kp, 128, tile_k)

    grid = (mp // tm, np_ // tn, kp // tk)

    # f32 outputs accumulate directly into the output block (no scratch).
    use_acc_scratch = jnp.dtype(out_dtype) != jnp.dtype(jnp.float32)
    scratch_shapes = [pltpu.VMEM((tm, tn), jnp.float32)] if use_acc_scratch else []

    kernel = functools.partial(_ternary_matmul_kernel, compute_dtype=compute_dtype)

    y_p = pl.pallas_call(
        kernel,
        out_shape=jax.ShapeDtypeStruct((mp, np_), out_dtype),
        grid_spec=pltpu.PrefetchScalarGridSpec(
            num_scalar_prefetch=0,
            grid=grid,
            in_specs=[
                pl.BlockSpec((tm, tk), lambda i, j, k: (i, k)),   # x tile (compute dtype)
                pl.BlockSpec((tn, tk), lambda i, j, k: (j, k)),   # W tile (int8)
                pl.BlockSpec((1, tn), lambda i, j, k: (0, j)),    # bias tile (f32)
            ],
            out_specs=pl.BlockSpec((tm, tn), lambda i, j, k: (i, j)),
            scratch_shapes=scratch_shapes,
        ),
        compiler_params=pltpu.CompilerParams(
            dimension_semantics=("parallel", "parallel", "arbitrary")),
    )(x_c, w_t, b_p)

    if (mp, np_) == (B, N):
        return y_p
    return y_p[:B, :N]


# ----------------------- references for validation -----------------------

def _ternarize_ref(w, left=-0.25, right=0.25):
    return jnp.where(w < left, -1.0, jnp.where(w >= right, 1.0, 0.0)).astype(jnp.float32)


def _reference_f32(x, w, b, left=-0.25, right=0.25):
    tw = _ternarize_ref(w, left, right)
    return x.astype(jnp.float32) @ tw.T + b[None, :]


def _reference_bf16(x, w, b, left=-0.25, right=0.25):
    # Mirrors the kernel's default compute dtype (bf16 operands, f32 accumulation).
    tw = _ternarize_ref(w, left, right).astype(jnp.bfloat16)
    y = jnp.dot(x.astype(jnp.bfloat16), tw.T, preferred_element_type=jnp.float32)
    return y + b[None, :].astype(jnp.float32)


if __name__ == "__main__":
    key = jax.random.PRNGKey(0)

    # --- case 1: small shapes implied by the module's forward ---
    batch, in_features, out_features = 8, 32, 16
    k1, k2, k3, key = jax.random.split(key, 4)
    x = jax.random.normal(k1, (batch, in_features), jnp.float32)
    w = jax.random.normal(k2, (out_features, in_features), jnp.float32)  # init.normal_(W,0,1)
    b = 0.1 * jax.random.normal(k3, (out_features,), jnp.float32)        # bias init'd here

    y = jax.block_until_ready(ternary_linear(x, w, b))
    assert y.shape == (batch, out_features)
    assert jnp.allclose(y.astype(jnp.float32), _reference_bf16(x, w, b),
                        atol=1e-2, rtol=1e-2), "mismatch vs bf16 reference (case 1)"
    assert jnp.allclose(y.astype(jnp.float32), _reference_f32(x, w, b),
                        atol=2e-1, rtol=2e-2), "mismatch vs f32 reference (case 1)"

    # Same case with exact-f32 activation math.
    y32 = jax.block_until_ready(
        ternary_linear(x, w, b, compute_dtype=jnp.float32))
    assert jnp.allclose(y32.astype(jnp.float32), _reference_f32(x, w, b),
                        atol=1e-2, rtol=1e-2), "mismatch vs f32 reference (case 1, f32 compute)"

    # --- case 2: exercises N tiling, big single-step K, and no padding ---
    batch, in_features, out_features = 16, 640, 384
    k1, k2, k3, key = jax.random.split(key, 4)
    x = jax.random.normal(k1, (batch, in_features), jnp.float32)
    w = jax.random.normal(k2, (out_features, in_features), jnp.float32)
    b = 0.1 * jax.random.normal(k3, (out_features,), jnp.float32)

    y = jax.block_until_ready(ternary_linear(x, w, b))
    assert y.shape == (batch, out_features)
    assert jnp.allclose(y.astype(jnp.float32), _reference_bf16(x, w, b),
                        atol=1e-2, rtol=1e-2), "mismatch vs bf16 reference (case 2)"
    assert jnp.allclose(y.astype(jnp.float32), _reference_f32(x, w, b),
                        atol=5e-1, rtol=2e-2), "mismatch vs f32 reference (case 2)"

    # Pre-ternarized int8 weight path must match bit-exactly.
    w_int8 = ternarize_weight(w)
    y_pre = jax.block_until_ready(ternary_linear(x, w_int8, b))
    assert jnp.array_equal(y, y_pre), "pre-ternarized int8 path mismatch"

    # Non-f32 output exercises the scratch-accumulator path.
    y_bf16 = jax.block_until_ready(
        ternary_linear(x, w, b, out_dtype=jnp.bfloat16))
    assert y_bf16.dtype == jnp.bfloat16
    assert jnp.allclose(y_bf16.astype(jnp.float32), _reference_bf16(x, w, b),
                        atol=2e-1, rtol=5e-2), "mismatch vs bf16 reference (bf16 out)"

    print("KERNEL_OK")
</pallas_src>

<mosaic_0001>
module attributes {stable_mosaic.version = 11 : i64} {
  func.func @_ternary_matmul_kernel(%arg0: i32, %arg1: i32, %arg2: i32, %arg3: memref<8x128xbf16, #tpu.memory_space<vmem>>, %arg4: memref<128x128xi8, #tpu.memory_space<vmem>>, %arg5: memref<1x128xf32, #tpu.memory_space<vmem>>, %arg6: memref<8x128xf32, #tpu.memory_space<vmem>>) attributes {dimension_semantics = [#tpu.dimension_semantics<parallel>, #tpu.dimension_semantics<parallel>, #tpu.dimension_semantics<arbitrary>], iteration_bounds = array<i64: 1, 1, 1>, scalar_prefetch = 0 : i64, scratch_operands = 0 : i64, tpu.core_type = #tpu.core_type<tc>, window_params = [{transform_indices = @transform_0, window_bounds = array<i64: 8, 128>}, {transform_indices = @transform_1, window_bounds = array<i64: 128, 128>}, {transform_indices = @transform_2, window_bounds = array<i64: 1, 128>}, {transform_indices = @transform_3, window_bounds = array<i64: 8, 128>}]} {
    %c0_i32 = arith.constant 0 : i32
    %0 = arith.cmpi eq, %arg2, %c0_i32 : i32
    %1 = arith.extui %0 : i1 to i32
    %c0_i32_0 = arith.constant 0 : i32
    %2 = arith.cmpi ne, %1, %c0_i32_0 : i32
    scf.if %2 {
      %cst_10 = arith.constant 0.000000e+00 : f32
      %13 = vector.broadcast %cst_10 : f32 to vector<8x128xf32>
      %c0_11 = arith.constant 0 : index
      %c0_12 = arith.constant 0 : index
      %14 = vector.load %arg6[%c0_11, %c0_12] : memref<8x128xf32, #tpu.memory_space<vmem>>, vector<8x128xf32>
      tpu.vector_store %arg6[%c0_11, %c0_12], %13 {strides = array<i32>} : memref<8x128xf32, #tpu.memory_space<vmem>>, vector<8x128xf32>,
    } else {
    }
    %c0 = arith.constant 0 : index
    %c0_1 = arith.constant 0 : index
    %3 = vector.load %arg3[%c0, %c0_1] : memref<8x128xbf16, #tpu.memory_space<vmem>>, vector<8x128xbf16>
    %c0_2 = arith.constant 0 : index
    %c0_3 = arith.constant 0 : index
    %4 = vector.load %arg4[%c0_2, %c0_3] : memref<128x128xi8, #tpu.memory_space<vmem>>, vector<128x128xi8>
    %5 = arith.sitofp %4 : vector<128x128xi8> to vector<128x128xbf16>
    %c0_4 = arith.constant 0 : index
    %c0_5 = arith.constant 0 : index
    %6 = vector.load %arg6[%c0_4, %c0_5] : memref<8x128xf32, #tpu.memory_space<vmem>>, vector<8x128xf32>
    %cst = arith.constant dense<0.000000e+00> : vector<8x128xf32>
    %7 = tpu.matmul %3, %5, %cst {dimension_numbers = #tpu.dot_dimension_numbers<[1], [1], [0], [0], [0, 0, 1, 0], [], []>} : vector<8x128xbf16>, vector<128x128xbf16>, vector<8x128xf32> -> vector<8x128xf32>
    %8 = arith.addf %6, %7 : vector<8x128xf32>
    %c0_6 = arith.constant 0 : index
    %c0_7 = arith.constant 0 : index
    %9 = vector.load %arg6[%c0_6, %c0_7] : memref<8x128xf32, #tpu.memory_space<vmem>>, vector<8x128xf32>
    tpu.vector_store %arg6[%c0_6, %c0_7], %8 {strides = array<i32>} : memref<8x128xf32, #tpu.memory_space<vmem>>, vector<8x128xf32>,
    %c0_i32_8 = arith.constant 0 : i32
    %10 = arith.cmpi eq, %arg2, %c0_i32_8 : i32
    %11 = arith.extui %10 : i1 to i32
    %c0_i32_9 = arith.constant 0 : i32
    %12 = arith.cmpi ne, %11, %c0_i32_9 : i32
    scf.if %12 {
      %c0_10 = arith.constant 0 : index
      %c0_11 = arith.constant 0 : index
      %13 = vector.load %arg6[%c0_10, %c0_11] : memref<8x128xf32, #tpu.memory_space<vmem>>, vector<8x128xf32>
      %c0_12 = arith.constant 0 : index
      %c0_13 = arith.constant 0 : index
      %14 = vector.load %arg5[%c0_12, %c0_13] : memref<1x128xf32, #tpu.memory_space<vmem>>, vector<1x128xf32>
      %15 = vector.broadcast %14 : vector<1x128xf32> to vector<8x128xf32>
      %16 = arith.addf %13, %15 : vector<8x128xf32>
      %c0_14 = arith.constant 0 : index
      %c0_15 = arith.constant 0 : index
      %17 = vector.load %arg6[%c0_14, %c0_15] : memref<8x128xf32, #tpu.memory_space<vmem>>, vector<8x128xf32>
      tpu.vector_store %arg6[%c0_14, %c0_15], %16 {strides = array<i32>} : memref<8x128xf32, #tpu.memory_space<vmem>>, vector<8x128xf32>,
    } else {
    }
    return
  }
  func.func @transform_0(%arg0: i32, %arg1: i32, %arg2: i32) -> (i32, i32) {
    %c0_i32 = arith.constant 0 : i32
    return %arg0, %arg2 : i32, i32
  }
  func.func @transform_1(%arg0: i32, %arg1: i32, %arg2: i32) -> (i32, i32) {
    %c0_i32 = arith.constant 0 : i32
    return %arg1, %arg2 : i32, i32
  }
  func.func @transform_2(%arg0: i32, %arg1: i32, %arg2: i32) -> (i32, i32) {
    %c0_i32 = arith.constant 0 : i32
    %c0_i32_0 = arith.constant 0 : i32
    return %c0_i32, %arg1 : i32, i32
  }
  func.func @transform_3(%arg0: i32, %arg1: i32, %arg2: i32) -> (i32, i32) {
    %c0_i32 = arith.constant 0 : i32
    return %arg0, %arg1 : i32, i32
  }
}

</mosaic_0001>

<bundles_post_ra>
// kernel: tpu_custom_call.1
= control target key start
LH: loop header
LB: loop body
LE: loop exit
PB: predicated region body
PF: predicated region fallthrough
CT: control target
= control target key end

     0   :  { %8 = vsyncpa [#allocation3], 0  ;;  %s274_s0 = inlined_call_operand.hbm [shape: bf16[8,128], index: 0, kind: input, shape index: {}]   ;;  %s275_s1 = inlined_call_operand.hbm [shape: s8[128,128], index: 1, kind: input, shape index: {}]   ;;  %s276_s2 = inlined_call_operand.vmem [shape: f32[1,128], index: 2, kind: input, shape index: {}]   ;;  %s277_s3 = inlined_call_operand.hbm [shape: f32[8,128], index: 3, kind: output, shape index: {}]  }
   0x1   :  { %9 = vsyncpa [#allocation6], 0 }
   0x2   :  { %10 = vsyncpa [#allocation4], 0  ;;  %s235_s12 = smov [#allocation2]   ;;  %s236_s14 = smov [#allocation5]  }
   0x3   :  { %s17_s13 = sshll.u32 %s235_s12, 4  ;;  %s26_s15 = sshll.u32 %s236_s14, 4  ;;  %s18_s13 = int_to_ptr.vmem [resolvable:$true] %s17_s13  ;;  %s27_s15 = int_to_ptr.vmem [resolvable:$true] %s26_s15 }
   0x4   :  { %s177_s16 = scalar_lea.vmem %s18_s13, 64  ;;  %p182_p1 = scmp.lt.s32.totalorder %s18_s13, %s18_s13 }
   0x5   :  { %p178_p0 = scmp.ne.s32.totalorder %s18_s13, %s177_s16  ;;  %p183_p2 = scmp.lt.s32.totalorder %s177_s16, %s177_s16 }
   0x7   :  { %p184_p3 = por %p183_p2, %p182_p1 }
   0x9   :  { %p185_p4 = pnand %p184_p3, %p178_p0 }
   0xb   :  { %188 = shalt.err (!%p185_p4)
}
   0xc   :  { %20 = dma.hbm_to_vmem [thread:$0]  %s274_s0, 64, %s18_s13, [#allocation3]  }
   0xd   :  { %s197_s19 = scalar_lea.vmem %s27_s15, 512  ;;  %p202_p6 = scmp.lt.s32.totalorder %s27_s15, %s27_s15 }
   0xe   :  { %p198_p5 = scmp.ne.s32.totalorder %s27_s15, %s197_s19  ;;  %p203_p7 = scmp.lt.s32.totalorder %s197_s19, %s197_s19 }
  0x10   :  { %p204_p8 = por %p203_p7, %p202_p6 }
  0x12   :  { %p205_p9 = pnand %p204_p8, %p198_p5 }
  0x14   :  { %208 = shalt.err (!%p205_p9)
}
  0x15   :  { %s237_s20 = smov 128   ;;  %s238_s21 = smov 8  }
  0x16   :  { %32 = dma.hbm_to_vmem [thread:$0]  %s275_s1, 512, %s27_s15, [#allocation6], %s237_s20, %s237_s20, %s238_s21  }
  0x17   :  { %229 = dma.done.wait [#allocation3], 64  }
  0x18   :  { %230 = vsyncadd [#allocation3], 4294967232 }
  0x19   :  { %231 = dma.done.wait [#allocation6], 512  }
  0x1a   :  { %232 = vsyncadd [#allocation6], 4294966784  ;;  %v239_v0 = vmov 0.0   ;;  %vm240_vm0 = vmmov 0   ;;  %v51_v1 = vld [vmem:[#allocation5 + $0x18] sm:$0xff]  ;;  %v50_v4 = vld [vmem:[#allocation5 + $0x10] sm:$0xff] }
  0x1b   :  { %142 = vmatprep.subr.bf16.mxu0 %v239_v0  ;;  %158 = vmatprep.mubr.msk.bf16.mxu0 %vm240_vm0, %v239_v0  ;;  %v59_v2 = vunpack.c.h.s8.bf16 %v51_v1  ;;  %v58_v3 = vunpack.c.l.s8.bf16 %v51_v1  ;;  %v57_v5 = vunpack.c.h.s8.bf16 %v50_v4  ;;  %v56_v6 = vunpack.c.l.s8.bf16 %v50_v4  ;;  %v49_v7 = vld [vmem:[#allocation5 + $0x8] sm:$0xff]  ;;  %v48_v10 = vld [vmem:[#allocation5] sm:$0xff]  ;;  %v47_v13 = vld [vmem:[#allocation2] sm:$0xf]  ;;  %s241_s24 = smov [#allocation7]  }
  0x1c   :  { %v55_v8 = vunpack.c.h.s8.bf16 %v49_v7  ;;  %v54_v9 = vunpack.c.l.s8.bf16 %v49_v7  ;;  %v53_v11 = vunpack.c.h.s8.bf16 %v48_v10  ;;  %v52_v12 = vunpack.c.l.s8.bf16 %v48_v10  ;;  %v132_v15 = vld [vmem:[%s276_s2] ss:$0 sm:$0xff]  ;;  %s122_s25 = sshll.u32 %s241_s24, 4  ;;  %s123_s25 = int_to_ptr.vmem [resolvable:$true] %s122_s25 }
  0x1d   :  { %143 = vmatpush3.bf16.xpose.msra.mxu0 %v59_v2  ;;  %s209_s26 = scalar_lea.vmem %s123_s25, 128  ;;  %p214_p11 = scmp.lt.s32.totalorder %s123_s25, %s123_s25 }
  0x1e   :  { %144 = vmatprep.subr.bf16.mxu0 %v239_v0  ;;  %p210_p10 = scmp.ne.s32.totalorder %s123_s25, %s209_s26  ;;  %p215_p12 = scmp.lt.s32.totalorder %s209_s26, %s209_s26 }
  0x20   :  { %p216_p13 = por %p215_p12, %p214_p11 }
  0x22   :  { %p217_p0 = pnand %p216_p13, %p210_p10 }
  0x25   :  { %145 = vmatpush3.bf16.xpose.msra.mxu0 %v58_v3 }
  0x26   :  { %146 = vmatprep.subr.bf16.mxu0 %v239_v0 }
  0x2d   :  { %147 = vmatpush3.bf16.xpose.msra.mxu0 %v57_v5 }
  0x2e   :  { %148 = vmatprep.subr.bf16.mxu0 %v239_v0 }
  0x35   :  { %149 = vmatpush3.bf16.xpose.msra.mxu0 %v56_v6 }
  0x36   :  { %150 = vmatprep.subr.bf16.mxu0 %v239_v0 }
  0x3d   :  { %151 = vmatpush3.bf16.xpose.msra.mxu0 %v55_v8 }
  0x3e   :  { %152 = vmatprep.subr.bf16.mxu0 %v239_v0 }
  0x45   :  { %153 = vmatpush3.bf16.xpose.msra.mxu0 %v54_v9 }
  0x46   :  { %154 = vmatprep.subr.bf16.mxu0 %v239_v0 }
  0x4d   :  { %155 = vmatpush3.bf16.xpose.msra.mxu0 %v53_v11 }
  0x4e   :  { %156 = vmatprep.subr.bf16.mxu0 %v239_v0 }
  0x55   :  { %157 = vmatpush3.bf16.xpose.msra.mxu0 %v52_v12 }
  0x5c   :  { %159 = vmatmul.mubr.bf16.vlgmr.msra.gmra.mxu0 %v47_v13 }
 0x11c   :  { %v95_v14 = vpop.f32.mrf.mxu0 }
 0x11d   :  { %v114_v17 = vadd.f32 %v132_v15, %v95_v14 }
 0x11e   :  { %v160_v16 = vpop.f32.mrf.mxu0 }
 0x11f   :  { %115 = vst [vmem:[#allocation7] sm:$0xff] %v114_v17 }
 0x120   :  { %v98_v18 = vpop.f32.mrf.mxu0 }
 0x122   :  { %v161_v19 = vpop.f32.mrf.mxu0 }
 0x123   :  { %220 = shalt.err (!%p217_p0)
}
 0x124   :  { %125 = dma.vmem_to_hbm [thread:$0]  %s123_s25, 128, %s277_s3, [#allocation4]  }
 0x125   :  { %233 = dma.done.wait [#allocation4], 128  }
 0x126   :  { %234 = vsyncadd [#allocation4], 4294967168 }
 0x127   :  { %129 = vsyncpa [#allocation3], 1 }
 0x128   :  { %130 = vsyncpa [#allocation6], 1 }
 0x129   :  { %131 = vsyncpa [#allocation4], 1 }

</bundles_post_ra>
